<compile_context>
chip_gen: v5e
topology: v5e:2x2
jax: 0.10.0
libtpu: 0.0.40
codegen_flags: <defaults>
</compile_context>

<pallas_src>
import functools

import jax
import jax.numpy as jnp
from jax.experimental import pallas as pl
from jax.experimental.pallas import tpu as pltpu


def _round_up(a, b):
    return pl.cdiv(a, b) * b


def _np_loss_stats_kernel(x_ref, t_ref, out_ref, *, hw, tile_rows,
                          sanitize, need_mask):
    """Accumulates per-batch partial reductions over a (batch, pixel-tile) grid.

    x_ref, t_ref : VMEM refs [1, C, tile_rows, 128]  (input dtype)
    out_ref      : VMEM ref  [1, 8, 8, 128] float32  (per-batch partial stats;
                   accumulated across the pixel-tile grid axis)
       [0] sum of -sum_c t*log_softmax(x)   (un-normalized CE)
       [1] sum(sigmoid(x)*t)   [2] sum(sigmoid(x))   [3] sum(t)
       [4] sum(x*t)            [5] sum(x)
       [6] max(x)  (elementwise over slab positions)   [7] min(x)
    """
    j = pl.program_id(1)

    x = x_ref[0].astype(jnp.float32)   # [C, R, 128]
    t = t_ref[0].astype(jnp.float32)   # [C, R, 128]

    valid = None
    if need_mask:
        # Validity mask for the zero-padded lane tail and (for ragged last
        # tiles) the uninitialized overhang rows.  Only the last pixel tile is
        # ever restrictive; for all other tiles this is cheap VPU filler.
        row_ids = jax.lax.broadcasted_iota(jnp.int32, (tile_rows, 128), 0)
        lane_ids = jax.lax.broadcasted_iota(jnp.int32, (tile_rows, 128), 1)
        pix = (j * tile_rows + row_ids) * 128 + lane_ids
        valid = pix < hw                                       # [R, 128]
        if sanitize:
            # Ragged last row-tile: overhang rows in VMEM are uninitialized
            # (possibly NaN/Inf) -> zero them before any math.
            x = jnp.where(valid[None], x, 0.0)
            t = jnp.where(valid[None], t, 0.0)

    # Class-axis reductions: class is the leading (non-minor) axis, so these
    # are pure VPU adds/max across dense (R,128) vreg slabs (no per-tile XLU).
    x_max = jnp.max(x, axis=0)                                 # [R, 128]
    x_min = jnp.min(x, axis=0)
    lse = x_max + jnp.log(jnp.sum(jnp.exp(x - x_max[None]), axis=0))
    t_sum = jnp.sum(t, axis=0)
    tx_sum = jnp.sum(t * x, axis=0)
    ce = lse * t_sum - tx_sum            # == 0 at padded pixels (t == 0, x == 0)

    # sigmoid via tanh: one EUP op / element instead of exp + reciprocal.
    s = 0.5 * jnp.tanh(0.5 * x) + 0.5
    st_sum = jnp.sum(s * t, axis=0)                            # 0 at padded pixels
    s_sum = jnp.sum(s, axis=0)
    x_sum = jnp.sum(x, axis=0)                                 # padded x == 0 -> 0

    if need_mask:
        s_sum = jnp.where(valid, s_sum, 0.0)                   # sigmoid(0)=0.5
        x_max = jnp.where(valid, x_max, -jnp.inf)
        x_min = jnp.where(valid, x_min, jnp.inf)

    # Fold each (tile_rows,128) statistic to a single (8,128) vreg slab.
    # The reshape is vreg-granular (free); the axis-0 reduce is plain VPU.
    ns = tile_rows // 8

    def ssum(v):
        return jnp.sum(v.reshape(ns, 8, 128), axis=0)

    def smax(v):
        return jnp.max(v.reshape(ns, 8, 128), axis=0)

    def smin(v):
        return jnp.min(v.reshape(ns, 8, 128), axis=0)

    @pl.when(j == 0)
    def _init():
        zeros = jnp.zeros((8, 128), jnp.float32)
        for k in range(6):
            out_ref[0, k] = zeros
        out_ref[0, 6] = jnp.full((8, 128), -jnp.inf, jnp.float32)
        out_ref[0, 7] = jnp.full((8, 128), jnp.inf, jnp.float32)

    # 8 single-vreg read-modify-writes per grid step.
    out_ref[0, 0] += ssum(ce)
    out_ref[0, 1] += ssum(st_sum)
    out_ref[0, 2] += ssum(s_sum)
    out_ref[0, 3] += ssum(t_sum)
    out_ref[0, 4] += ssum(tx_sum)
    out_ref[0, 5] += ssum(x_sum)
    out_ref[0, 6] = jnp.maximum(out_ref[0, 6], smax(x_max))
    out_ref[0, 7] = jnp.minimum(out_ref[0, 7], smin(x_min))


@functools.partial(jax.jit, static_argnames=("smooth",))
def np_branch_loss(logits_nchw, targets_nchw, smooth=1e-7):
    """JAX/Pallas equivalent of _NPBranchLoss.forward(logits, targets)."""
    N, C, H, W = logits_nchw.shape
    HW = H * W
    itemsize = jnp.dtype(logits_nchw.dtype).itemsize

    # dtype-native sublane multiple: 8 (f32), 16 (bf16/f16), 32 (int8/fp8).
    sub = max(8, 32 // itemsize)

    rows = pl.cdiv(HW, 128)
    rows_p = _round_up(rows, sub)               # minimal sublane-aligned rows
    hw_pad = rows_p * 128

    # ~2 MiB per input block (double-buffered by the pipeline).
    budget = 2 * 1024 * 1024
    tr_max = max(sub, ((budget // (C * 128 * itemsize)) // sub) * sub)
    tr_max = min(tr_max, rows_p)
    # TODO(synk): for very large C (C*sub*128*itemsize > budget) split the
    # class axis over a grid dimension with an online-LSE update.
    num_tiles = pl.cdiv(rows_p, tr_max)
    # Balanced tile size: avoids a tiny/ragged-only last tile, no HBM padding.
    tile_rows = min(_round_up(pl.cdiv(rows_p, num_tiles), sub), tr_max)
    num_tiles = pl.cdiv(rows_p, tile_rows)

    sanitize = (rows_p % tile_rows) != 0        # ragged last tile reads garbage
    need_mask = sanitize or (hw_pad != HW)

    # Free, contiguous reshape (no transpose pass over HBM).  The only pad is
    # the minimal lane/sublane alignment (< sub*128 pixels) and is skipped
    # entirely when H*W is already sub*128-aligned.
    # TODO(synk): a fully pad-free path for odd H*W would need a flat-pixel
    # in-kernel layout (class on sublanes), which costs more on the VPU/XLU.
    x = logits_nchw.reshape(N, C, HW)
    t = targets_nchw.reshape(N, C, HW)
    if hw_pad != HW:
        x = jnp.pad(x, ((0, 0), (0, 0), (0, hw_pad - HW)))
        t = jnp.pad(t, ((0, 0), (0, 0), (0, hw_pad - HW)))
    x = x.reshape(N, C, rows_p, 128)
    t = t.reshape(N, C, rows_p, 128)

    # VMEM budget: 2 inputs x 2 pipeline buffers x block, plus the f32
    # in-kernel temporaries (casts, exp term, sigmoid, products), plus the
    # tiny double-buffered output block and margin.  Cap at 75% of physical
    # VMEM so Mosaic internal scratch still fits (v7x has only 64 MiB).
    block_bytes = C * tile_rows * 128 * itemsize
    f32_block = C * tile_rows * 128 * 4
    out_bytes = 2 * 8 * 8 * 128 * 4
    est = 4 * block_bytes + 6 * f32_block + out_bytes + (2 << 20)
    try:
        phys_vmem = int(pltpu.get_tpu_info().vmem_capacity_bytes)
    except Exception:
        phys_vmem = 64 * 1024 * 1024
    vmem_limit = int(min(max(est, 16 * 1024 * 1024), (phys_vmem * 3) // 4))

    kernel = functools.partial(
        _np_loss_stats_kernel, hw=HW, tile_rows=tile_rows,
        sanitize=sanitize, need_mask=need_mask)

    block = (1, C, tile_rows, 128)
    stats = pl.pallas_call(
        kernel,
        out_shape=jax.ShapeDtypeStruct((N, 8, 8, 128), jnp.float32),
        grid_spec=pltpu.PrefetchScalarGridSpec(
            num_scalar_prefetch=0,
            grid=(N, num_tiles),
            in_specs=[
                pl.BlockSpec(block, lambda n, j: (n, 0, j, 0)),
                pl.BlockSpec(block, lambda n, j: (n, 0, j, 0)),
            ],
            # Per-batch partial stats; block depends only on n, so the pixel
            # axis accumulates in-place and the batch axis can be sharded
            # across TensorCores (v7x megacore).
            out_specs=pl.BlockSpec((1, 8, 8, 128), lambda n, j: (n, 0, 0, 0)),
        ),
        compiler_params=pltpu.CompilerParams(
            dimension_semantics=("parallel", "arbitrary"),
            vmem_limit_bytes=vmem_limit,
        ),
    )(x, t)

    # Tiny final cross-lane reductions in plain JAX (N*8*8*128 f32 elements).
    ce_sum = jnp.sum(stats[:, 0])
    sum_st = jnp.sum(stats[:, 1])
    sum_s = jnp.sum(stats[:, 2])
    sum_t = jnp.sum(stats[:, 3])
    sum_xt = jnp.sum(stats[:, 4])
    sum_x = jnp.sum(stats[:, 5])
    max_x = jnp.max(stats[:, 6])
    min_x = jnp.min(stats[:, 7])

    # F.cross_entropy(..., reduction='mean') with probability targets divides
    # by the number of non-class elements: N * H * W.
    ce = ce_sum / jnp.float32(N * H * W)

    # DiceCoeff (global, as in the spec): if not (max(x)==1 and min(x)>=0),
    # probs = sigmoid(x); dice over the flattened N*C*H*W tensor.
    use_raw = jnp.logical_and(max_x == jnp.float32(1.0), min_x >= jnp.float32(0.0))
    intersection = jnp.where(use_raw, sum_xt, sum_st)
    probs_sum = jnp.where(use_raw, sum_x, sum_s)
    smooth_f = jnp.float32(smooth)
    dice = (2.0 * intersection + smooth_f) / (probs_sum + sum_t + smooth_f)

    return ce + 1.0 - dice


def _reference_loss(logits, targets, smooth=1e-7):
    """Pure-JAX reference for a correctness sanity check."""
    x = logits.astype(jnp.float32)
    t = targets.astype(jnp.float32)
    logp = jax.nn.log_softmax(x, axis=1)
    ce = jnp.mean(-jnp.sum(t * logp, axis=1))
    use_raw = jnp.logical_and(jnp.max(x) == 1.0, jnp.min(x) >= 0.0)
    probs = jnp.where(use_raw, x, jax.nn.sigmoid(x))
    inter = jnp.sum(probs * t)
    dice = (2.0 * inter + smooth) / (jnp.sum(probs) + jnp.sum(t) + smooth)
    return ce + 1.0 - dice


if __name__ == "__main__":
    key = jax.random.PRNGKey(0)
    k_logits, k_labels = jax.random.split(key)

    N, C, H, W = 2, 4, 16, 16
    logits = jax.random.normal(k_logits, (N, C, H, W), dtype=jnp.float32)
    # Targets: one-hot class probabilities with the same NCHW shape as logits.
    labels = jax.random.randint(k_labels, (N, H, W), 0, C)
    targets = jnp.transpose(jax.nn.one_hot(labels, C, dtype=jnp.float32),
                            (0, 3, 1, 2))                           # NCHW

    loss = jax.block_until_ready(np_branch_loss(logits, targets))
    ref = jax.block_until_ready(_reference_loss(logits, targets))
    assert jnp.allclose(loss, ref, rtol=1e-5, atol=1e-5), (loss, ref)

    print("KERNEL_OK")
</pallas_src>

<mosaic_0001>
module attributes {stable_mosaic.version = 11 : i64} {
  func.func @_np_loss_stats_kernel(%arg0: i32, %arg1: i32, %arg2: memref<1x4x8x128xf32, #tpu.memory_space<vmem>>, %arg3: memref<1x4x8x128xf32, #tpu.memory_space<vmem>>, %arg4: memref<1x8x8x128xf32, #tpu.memory_space<vmem>>) attributes {dimension_semantics = [#tpu.dimension_semantics<parallel>, #tpu.dimension_semantics<arbitrary>], iteration_bounds = array<i64: 2, 1>, scalar_prefetch = 0 : i64, scratch_operands = 0 : i64, tpu.core_type = #tpu.core_type<tc>, window_params = [{transform_indices = @transform_0, window_bounds = array<i64: 1, 4, 8, 128>}, {transform_indices = @transform_1, window_bounds = array<i64: 1, 4, 8, 128>}, {transform_indices = @transform_2, window_bounds = array<i64: 1, 8, 8, 128>}]} {
    %c0 = arith.constant 0 : index
    %c0_0 = arith.constant 0 : index
    %c0_1 = arith.constant 0 : index
    %c0_2 = arith.constant 0 : index
    %0 = vector.load %arg2[%c0, %c0_0, %c0_1, %c0_2] : memref<1x4x8x128xf32, #tpu.memory_space<vmem>>, vector<1x4x8x128xf32>
    %1 = vector.shape_cast %0 : vector<1x4x8x128xf32> to vector<4x8x128xf32>
    %c0_3 = arith.constant 0 : index
    %c0_4 = arith.constant 0 : index
    %c0_5 = arith.constant 0 : index
    %c0_6 = arith.constant 0 : index
    %2 = vector.load %arg3[%c0_3, %c0_4, %c0_5, %c0_6] : memref<1x4x8x128xf32, #tpu.memory_space<vmem>>, vector<1x4x8x128xf32>
    %3 = vector.shape_cast %2 : vector<1x4x8x128xf32> to vector<4x8x128xf32>
    %4 = tpu.iota {dimensions = array<i32: 0>} : vector<8x128xi32>
    %5 = tpu.iota {dimensions = array<i32: 1>} : vector<8x128xi32>
    %c8_i32 = arith.constant 8 : i32
    %6 = arith.muli %arg1, %c8_i32 : i32
    %7 = vector.broadcast %6 : i32 to vector<8x128xi32>
    %8 = arith.addi %7, %4 : vector<8x128xi32>
    %c128_i32 = arith.constant 128 : i32
    %9 = vector.broadcast %c128_i32 : i32 to vector<8x128xi32>
    %10 = arith.muli %8, %9 : vector<8x128xi32>
    %11 = arith.addi %10, %5 : vector<8x128xi32>
    %c256_i32 = arith.constant 256 : i32
    %12 = vector.broadcast %c256_i32 : i32 to vector<8x128xi32>
    %13 = arith.cmpi slt, %11, %12 : vector<8x128xi32>
    %cst = arith.constant dense<0xFF800000> : vector<8x128xf32>
    %14 = vector.multi_reduction <maximumf>, %1, %cst [0] : vector<4x8x128xf32> to vector<8x128xf32>
    %cst_7 = arith.constant dense<0x7F800000> : vector<8x128xf32>
    %15 = vector.multi_reduction <minimumf>, %1, %cst_7 [0] : vector<4x8x128xf32> to vector<8x128xf32>
    %16 = vector.shape_cast %14 : vector<8x128xf32> to vector<1x8x128xf32>
    %17 = vector.broadcast %16 : vector<1x8x128xf32> to vector<4x8x128xf32>
    %18 = arith.subf %1, %17 : vector<4x8x128xf32>
    %19 = math.exp %18 : vector<4x8x128xf32>
    %cst_8 = arith.constant dense<0.000000e+00> : vector<8x128xf32>
    %20 = vector.multi_reduction <add>, %19, %cst_8 [0] : vector<4x8x128xf32> to vector<8x128xf32>
    %21 = math.log %20 : vector<8x128xf32>
    %22 = arith.addf %14, %21 : vector<8x128xf32>
    %cst_9 = arith.constant dense<0.000000e+00> : vector<8x128xf32>
    %23 = vector.multi_reduction <add>, %3, %cst_9 [0] : vector<4x8x128xf32> to vector<8x128xf32>
    %24 = arith.mulf %3, %1 : vector<4x8x128xf32>
    %cst_10 = arith.constant dense<0.000000e+00> : vector<8x128xf32>
    %25 = vector.multi_reduction <add>, %24, %cst_10 [0] : vector<4x8x128xf32> to vector<8x128xf32>
    %26 = arith.mulf %22, %23 : vector<8x128xf32>
    %27 = arith.subf %26, %25 : vector<8x128xf32>
    %cst_11 = arith.constant 5.000000e-01 : f32
    %28 = vector.broadcast %cst_11 : f32 to vector<4x8x128xf32>
    %29 = arith.mulf %28, %1 : vector<4x8x128xf32>
    %30 = math.tanh %29 : vector<4x8x128xf32>
    %cst_12 = arith.constant 5.000000e-01 : f32
    %31 = vector.broadcast %cst_12 : f32 to vector<4x8x128xf32>
    %32 = arith.mulf %31, %30 : vector<4x8x128xf32>
    %cst_13 = arith.constant 5.000000e-01 : f32
    %33 = vector.broadcast %cst_13 : f32 to vector<4x8x128xf32>
    %34 = arith.addf %32, %33 : vector<4x8x128xf32>
    %35 = arith.mulf %34, %3 : vector<4x8x128xf32>
    %cst_14 = arith.constant dense<0.000000e+00> : vector<8x128xf32>
    %36 = vector.multi_reduction <add>, %35, %cst_14 [0] : vector<4x8x128xf32> to vector<8x128xf32>
    %cst_15 = arith.constant dense<0.000000e+00> : vector<8x128xf32>
    %37 = vector.multi_reduction <add>, %34, %cst_15 [0] : vector<4x8x128xf32> to vector<8x128xf32>
    %cst_16 = arith.constant dense<0.000000e+00> : vector<8x128xf32>
    %38 = vector.multi_reduction <add>, %1, %cst_16 [0] : vector<4x8x128xf32> to vector<8x128xf32>
    %cst_17 = arith.constant 0.000000e+00 : f32
    %39 = vector.broadcast %cst_17 : f32 to vector<8x128xf32>
    %40 = arith.select %13, %37, %39 : vector<8x128xi1>, vector<8x128xf32>
    %cst_18 = arith.constant 0xFF800000 : f32
    %41 = vector.broadcast %cst_18 : f32 to vector<8x128xf32>
    %42 = arith.select %13, %14, %41 : vector<8x128xi1>, vector<8x128xf32>
    %cst_19 = arith.constant 0x7F800000 : f32
    %43 = vector.broadcast %cst_19 : f32 to vector<8x128xf32>
    %44 = arith.select %13, %15, %43 : vector<8x128xi1>, vector<8x128xf32>
    %c0_i32 = arith.constant 0 : i32
    %45 = arith.cmpi eq, %arg1, %c0_i32 : i32
    %46 = arith.extui %45 : i1 to i32
    %c0_i32_20 = arith.constant 0 : i32
    %47 = arith.cmpi ne, %46, %c0_i32_20 : i32
    scf.if %47 {
      %cst_86 = arith.constant 0.000000e+00 : f32
      %112 = vector.broadcast %cst_86 : f32 to vector<8x128xf32>
      %c0_87 = arith.constant 0 : index
      %c0_88 = arith.constant 0 : index
      %c0_89 = arith.constant 0 : index
      %c0_90 = arith.constant 0 : index
      %113 = vector.load %arg4[%c0_87, %c0_88, %c0_89, %c0_90] : memref<1x8x8x128xf32, #tpu.memory_space<vmem>>, vector<1x1x8x128xf32>
      %114 = vector.shape_cast %113 : vector<1x1x8x128xf32> to vector<8x128xf32>
      %115 = vector.shape_cast %112 : vector<8x128xf32> to vector<1x1x8x128xf32>
      tpu.vector_store %arg4[%c0_87, %c0_88, %c0_89, %c0_90], %115 {strides = array<i32>} : memref<1x8x8x128xf32, #tpu.memory_space<vmem>>, vector<1x1x8x128xf32>,
      %c0_91 = arith.constant 0 : index
      %c1_92 = arith.constant 1 : index
      %c0_93 = arith.constant 0 : index
      %c0_94 = arith.constant 0 : index
      %116 = vector.load %arg4[%c0_91, %c1_92, %c0_93, %c0_94] : memref<1x8x8x128xf32, #tpu.memory_space<vmem>>, vector<1x1x8x128xf32>
      %117 = vector.shape_cast %116 : vector<1x1x8x128xf32> to vector<8x128xf32>
      %118 = vector.shape_cast %112 : vector<8x128xf32> to vector<1x1x8x128xf32>
      tpu.vector_store %arg4[%c0_91, %c1_92, %c0_93, %c0_94], %118 {strides = array<i32>} : memref<1x8x8x128xf32, #tpu.memory_space<vmem>>, vector<1x1x8x128xf32>,
      %c0_95 = arith.constant 0 : index
      %c2_96 = arith.constant 2 : index
      %c0_97 = arith.constant 0 : index
      %c0_98 = arith.constant 0 : index
      %119 = vector.load %arg4[%c0_95, %c2_96, %c0_97, %c0_98] : memref<1x8x8x128xf32, #tpu.memory_space<vmem>>, vector<1x1x8x128xf32>
      %120 = vector.shape_cast %119 : vector<1x1x8x128xf32> to vector<8x128xf32>
      %121 = vector.shape_cast %112 : vector<8x128xf32> to vector<1x1x8x128xf32>
      tpu.vector_store %arg4[%c0_95, %c2_96, %c0_97, %c0_98], %121 {strides = array<i32>} : memref<1x8x8x128xf32, #tpu.memory_space<vmem>>, vector<1x1x8x128xf32>,
      %c0_99 = arith.constant 0 : index
      %c3_100 = arith.constant 3 : index
      %c0_101 = arith.constant 0 : index
      %c0_102 = arith.constant 0 : index
      %122 = vector.load %arg4[%c0_99, %c3_100, %c0_101, %c0_102] : memref<1x8x8x128xf32, #tpu.memory_space<vmem>>, vector<1x1x8x128xf32>
      %123 = vector.shape_cast %122 : vector<1x1x8x128xf32> to vector<8x128xf32>
      %124 = vector.shape_cast %112 : vector<8x128xf32> to vector<1x1x8x128xf32>
      tpu.vector_store %arg4[%c0_99, %c3_100, %c0_101, %c0_102], %124 {strides = array<i32>} : memref<1x8x8x128xf32, #tpu.memory_space<vmem>>, vector<1x1x8x128xf32>,
      %c0_103 = arith.constant 0 : index
      %c4_104 = arith.constant 4 : index
      %c0_105 = arith.constant 0 : index
      %c0_106 = arith.constant 0 : index
      %125 = vector.load %arg4[%c0_103, %c4_104, %c0_105, %c0_106] : memref<1x8x8x128xf32, #tpu.memory_space<vmem>>, vector<1x1x8x128xf32>
      %126 = vector.shape_cast %125 : vector<1x1x8x128xf32> to vector<8x128xf32>
      %127 = vector.shape_cast %112 : vector<8x128xf32> to vector<1x1x8x128xf32>
      tpu.vector_store %arg4[%c0_103, %c4_104, %c0_105, %c0_106], %127 {strides = array<i32>} : memref<1x8x8x128xf32, #tpu.memory_space<vmem>>, vector<1x1x8x128xf32>,
      %c0_107 = arith.constant 0 : index
      %c5_108 = arith.constant 5 : index
      %c0_109 = arith.constant 0 : index
      %c0_110 = arith.constant 0 : index
      %128 = vector.load %arg4[%c0_107, %c5_108, %c0_109, %c0_110] : memref<1x8x8x128xf32, #tpu.memory_space<vmem>>, vector<1x1x8x128xf32>
      %129 = vector.shape_cast %128 : vector<1x1x8x128xf32> to vector<8x128xf32>
      %130 = vector.shape_cast %112 : vector<8x128xf32> to vector<1x1x8x128xf32>
      tpu.vector_store %arg4[%c0_107, %c5_108, %c0_109, %c0_110], %130 {strides = array<i32>} : memref<1x8x8x128xf32, #tpu.memory_space<vmem>>, vector<1x1x8x128xf32>,
      %cst_111 = arith.constant 0xFF800000 : f32
      %131 = vector.broadcast %cst_111 : f32 to vector<8x128xf32>
      %c0_112 = arith.constant 0 : index
      %c6_113 = arith.constant 6 : index
      %c0_114 = arith.constant 0 : index
      %c0_115 = arith.constant 0 : index
      %132 = vector.load %arg4[%c0_112, %c6_113, %c0_114, %c0_115] : memref<1x8x8x128xf32, #tpu.memory_space<vmem>>, vector<1x1x8x128xf32>
      %133 = vector.shape_cast %132 : vector<1x1x8x128xf32> to vector<8x128xf32>
      %134 = vector.shape_cast %131 : vector<8x128xf32> to vector<1x1x8x128xf32>
      tpu.vector_store %arg4[%c0_112, %c6_113, %c0_114, %c0_115], %134 {strides = array<i32>} : memref<1x8x8x128xf32, #tpu.memory_space<vmem>>, vector<1x1x8x128xf32>,
      %cst_116 = arith.constant 0x7F800000 : f32
      %135 = vector.broadcast %cst_116 : f32 to vector<8x128xf32>
      %c0_117 = arith.constant 0 : index
      %c7_118 = arith.constant 7 : index
      %c0_119 = arith.constant 0 : index
      %c0_120 = arith.constant 0 : index
      %136 = vector.load %arg4[%c0_117, %c7_118, %c0_119, %c0_120] : memref<1x8x8x128xf32, #tpu.memory_space<vmem>>, vector<1x1x8x128xf32>
      %137 = vector.shape_cast %136 : vector<1x1x8x128xf32> to vector<8x128xf32>
      %138 = vector.shape_cast %135 : vector<8x128xf32> to vector<1x1x8x128xf32>
      tpu.vector_store %arg4[%c0_117, %c7_118, %c0_119, %c0_120], %138 {strides = array<i32>} : memref<1x8x8x128xf32, #tpu.memory_space<vmem>>, vector<1x1x8x128xf32>,
    } else {
    }
    %c0_21 = arith.constant 0 : index
    %c0_22 = arith.constant 0 : index
    %c0_23 = arith.constant 0 : index
    %c0_24 = arith.constant 0 : index
    %48 = vector.load %arg4[%c0_21, %c0_22, %c0_23, %c0_24] : memref<1x8x8x128xf32, #tpu.memory_space<vmem>>, vector<1x1x8x128xf32>
    %49 = vector.shape_cast %48 : vector<1x1x8x128xf32> to vector<8x128xf32>
    %50 = vector.shape_cast %27 : vector<8x128xf32> to vector<1x8x128xf32>
    %cst_25 = arith.constant dense<0.000000e+00> : vector<8x128xf32>
    %51 = vector.multi_reduction <add>, %50, %cst_25 [0] : vector<1x8x128xf32> to vector<8x128xf32>
    %52 = arith.addf %49, %51 : vector<8x128xf32>
    %c0_26 = arith.constant 0 : index
    %c0_27 = arith.constant 0 : index
    %c0_28 = arith.constant 0 : index
    %c0_29 = arith.constant 0 : index
    %53 = vector.load %arg4[%c0_26, %c0_27, %c0_28, %c0_29] : memref<1x8x8x128xf32, #tpu.memory_space<vmem>>, vector<1x1x8x128xf32>
    %54 = vector.shape_cast %53 : vector<1x1x8x128xf32> to vector<8x128xf32>
    %55 = vector.shape_cast %52 : vector<8x128xf32> to vector<1x1x8x128xf32>
    tpu.vector_store %arg4[%c0_26, %c0_27, %c0_28, %c0_29], %55 {strides = array<i32>} : memref<1x8x8x128xf32, #tpu.memory_space<vmem>>, vector<1x1x8x128xf32>,
    %c0_30 = arith.constant 0 : index
    %c1 = arith.constant 1 : index
    %c0_31 = arith.constant 0 : index
    %c0_32 = arith.constant 0 : index
    %56 = vector.load %arg4[%c0_30, %c1, %c0_31, %c0_32] : memref<1x8x8x128xf32, #tpu.memory_space<vmem>>, vector<1x1x8x128xf32>
    %57 = vector.shape_cast %56 : vector<1x1x8x128xf32> to vector<8x128xf32>
    %58 = vector.shape_cast %36 : vector<8x128xf32> to vector<1x8x128xf32>
    %cst_33 = arith.constant dense<0.000000e+00> : vector<8x128xf32>
    %59 = vector.multi_reduction <add>, %58, %cst_33 [0] : vector<1x8x128xf32> to vector<8x128xf32>
    %60 = arith.addf %57, %59 : vector<8x128xf32>
    %c0_34 = arith.constant 0 : index
    %c1_35 = arith.constant 1 : index
    %c0_36 = arith.constant 0 : index
    %c0_37 = arith.constant 0 : index
    %61 = vector.load %arg4[%c0_34, %c1_35, %c0_36, %c0_37] : memref<1x8x8x128xf32, #tpu.memory_space<vmem>>, vector<1x1x8x128xf32>
    %62 = vector.shape_cast %61 : vector<1x1x8x128xf32> to vector<8x128xf32>
    %63 = vector.shape_cast %60 : vector<8x128xf32> to vector<1x1x8x128xf32>
    tpu.vector_store %arg4[%c0_34, %c1_35, %c0_36, %c0_37], %63 {strides = array<i32>} : memref<1x8x8x128xf32, #tpu.memory_space<vmem>>, vector<1x1x8x128xf32>,
    %c0_38 = arith.constant 0 : index
    %c2 = arith.constant 2 : index
    %c0_39 = arith.constant 0 : index
    %c0_40 = arith.constant 0 : index
    %64 = vector.load %arg4[%c0_38, %c2, %c0_39, %c0_40] : memref<1x8x8x128xf32, #tpu.memory_space<vmem>>, vector<1x1x8x128xf32>
    %65 = vector.shape_cast %64 : vector<1x1x8x128xf32> to vector<8x128xf32>
    %66 = vector.shape_cast %40 : vector<8x128xf32> to vector<1x8x128xf32>
    %cst_41 = arith.constant dense<0.000000e+00> : vector<8x128xf32>
    %67 = vector.multi_reduction <add>, %66, %cst_41 [0] : vector<1x8x128xf32> to vector<8x128xf32>
    %68 = arith.addf %65, %67 : vector<8x128xf32>
    %c0_42 = arith.constant 0 : index
    %c2_43 = arith.constant 2 : index
    %c0_44 = arith.constant 0 : index
    %c0_45 = arith.constant 0 : index
    %69 = vector.load %arg4[%c0_42, %c2_43, %c0_44, %c0_45] : memref<1x8x8x128xf32, #tpu.memory_space<vmem>>, vector<1x1x8x128xf32>
    %70 = vector.shape_cast %69 : vector<1x1x8x128xf32> to vector<8x128xf32>
    %71 = vector.shape_cast %68 : vector<8x128xf32> to vector<1x1x8x128xf32>
    tpu.vector_store %arg4[%c0_42, %c2_43, %c0_44, %c0_45], %71 {strides = array<i32>} : memref<1x8x8x128xf32, #tpu.memory_space<vmem>>, vector<1x1x8x128xf32>,
    %c0_46 = arith.constant 0 : index
    %c3 = arith.constant 3 : index
    %c0_47 = arith.constant 0 : index
    %c0_48 = arith.constant 0 : index
    %72 = vector.load %arg4[%c0_46, %c3, %c0_47, %c0_48] : memref<1x8x8x128xf32, #tpu.memory_space<vmem>>, vector<1x1x8x128xf32>
    %73 = vector.shape_cast %72 : vector<1x1x8x128xf32> to vector<8x128xf32>
    %74 = vector.shape_cast %23 : vector<8x128xf32> to vector<1x8x128xf32>
    %cst_49 = arith.constant dense<0.000000e+00> : vector<8x128xf32>
    %75 = vector.multi_reduction <add>, %74, %cst_49 [0] : vector<1x8x128xf32> to vector<8x128xf32>
    %76 = arith.addf %73, %75 : vector<8x128xf32>
    %c0_50 = arith.constant 0 : index
    %c3_51 = arith.constant 3 : index
    %c0_52 = arith.constant 0 : index
    %c0_53 = arith.constant 0 : index
    %77 = vector.load %arg4[%c0_50, %c3_51, %c0_52, %c0_53] : memref<1x8x8x128xf32, #tpu.memory_space<vmem>>, vector<1x1x8x128xf32>
    %78 = vector.shape_cast %77 : vector<1x1x8x128xf32> to vector<8x128xf32>
    %79 = vector.shape_cast %76 : vector<8x128xf32> to vector<1x1x8x128xf32>
    tpu.vector_store %arg4[%c0_50, %c3_51, %c0_52, %c0_53], %79 {strides = array<i32>} : memref<1x8x8x128xf32, #tpu.memory_space<vmem>>, vector<1x1x8x128xf32>,
    %c0_54 = arith.constant 0 : index
    %c4 = arith.constant 4 : index
    %c0_55 = arith.constant 0 : index
    %c0_56 = arith.constant 0 : index
    %80 = vector.load %arg4[%c0_54, %c4, %c0_55, %c0_56] : memref<1x8x8x128xf32, #tpu.memory_space<vmem>>, vector<1x1x8x128xf32>
    %81 = vector.shape_cast %80 : vector<1x1x8x128xf32> to vector<8x128xf32>
    %82 = vector.shape_cast %25 : vector<8x128xf32> to vector<1x8x128xf32>
    %cst_57 = arith.constant dense<0.000000e+00> : vector<8x128xf32>
    %83 = vector.multi_reduction <add>, %82, %cst_57 [0] : vector<1x8x128xf32> to vector<8x128xf32>
    %84 = arith.addf %81, %83 : vector<8x128xf32>
    %c0_58 = arith.constant 0 : index
    %c4_59 = arith.constant 4 : index
    %c0_60 = arith.constant 0 : index
    %c0_61 = arith.constant 0 : index
    %85 = vector.load %arg4[%c0_58, %c4_59, %c0_60, %c0_61] : memref<1x8x8x128xf32, #tpu.memory_space<vmem>>, vector<1x1x8x128xf32>
    %86 = vector.shape_cast %85 : vector<1x1x8x128xf32> to vector<8x128xf32>
    %87 = vector.shape_cast %84 : vector<8x128xf32> to vector<1x1x8x128xf32>
    tpu.vector_store %arg4[%c0_58, %c4_59, %c0_60, %c0_61], %87 {strides = array<i32>} : memref<1x8x8x128xf32, #tpu.memory_space<vmem>>, vector<1x1x8x128xf32>,
    %c0_62 = arith.constant 0 : index
    %c5 = arith.constant 5 : index
    %c0_63 = arith.constant 0 : index
    %c0_64 = arith.constant 0 : index
    %88 = vector.load %arg4[%c0_62, %c5, %c0_63, %c0_64] : memref<1x8x8x128xf32, #tpu.memory_space<vmem>>, vector<1x1x8x128xf32>
    %89 = vector.shape_cast %88 : vector<1x1x8x128xf32> to vector<8x128xf32>
    %90 = vector.shape_cast %38 : vector<8x128xf32> to vector<1x8x128xf32>
    %cst_65 = arith.constant dense<0.000000e+00> : vector<8x128xf32>
    %91 = vector.multi_reduction <add>, %90, %cst_65 [0] : vector<1x8x128xf32> to vector<8x128xf32>
    %92 = arith.addf %89, %91 : vector<8x128xf32>
    %c0_66 = arith.constant 0 : index
    %c5_67 = arith.constant 5 : index
    %c0_68 = arith.constant 0 : index
    %c0_69 = arith.constant 0 : index
    %93 = vector.load %arg4[%c0_66, %c5_67, %c0_68, %c0_69] : memref<1x8x8x128xf32, #tpu.memory_space<vmem>>, vector<1x1x8x128xf32>
    %94 = vector.shape_cast %93 : vector<1x1x8x128xf32> to vector<8x128xf32>
    %95 = vector.shape_cast %92 : vector<8x128xf32> to vector<1x1x8x128xf32>
    tpu.vector_store %arg4[%c0_66, %c5_67, %c0_68, %c0_69], %95 {strides = array<i32>} : memref<1x8x8x128xf32, #tpu.memory_space<vmem>>, vector<1x1x8x128xf32>,
    %c0_70 = arith.constant 0 : index
    %c6 = arith.constant 6 : index
    %c0_71 = arith.constant 0 : index
    %c0_72 = arith.constant 0 : index
    %96 = vector.load %arg4[%c0_70, %c6, %c0_71, %c0_72] : memref<1x8x8x128xf32, #tpu.memory_space<vmem>>, vector<1x1x8x128xf32>
    %97 = vector.shape_cast %96 : vector<1x1x8x128xf32> to vector<8x128xf32>
    %98 = vector.shape_cast %42 : vector<8x128xf32> to vector<1x8x128xf32>
    %cst_73 = arith.constant dense<0xFF800000> : vector<8x128xf32>
    %99 = vector.multi_reduction <maximumf>, %98, %cst_73 [0] : vector<1x8x128xf32> to vector<8x128xf32>
    %100 = arith.maximumf %97, %99 : vector<8x128xf32>
    %c0_74 = arith.constant 0 : index
    %c6_75 = arith.constant 6 : index
    %c0_76 = arith.constant 0 : index
    %c0_77 = arith.constant 0 : index
    %101 = vector.load %arg4[%c0_74, %c6_75, %c0_76, %c0_77] : memref<1x8x8x128xf32, #tpu.memory_space<vmem>>, vector<1x1x8x128xf32>
    %102 = vector.shape_cast %101 : vector<1x1x8x128xf32> to vector<8x128xf32>
    %103 = vector.shape_cast %100 : vector<8x128xf32> to vector<1x1x8x128xf32>
    tpu.vector_store %arg4[%c0_74, %c6_75, %c0_76, %c0_77], %103 {strides = array<i32>} : memref<1x8x8x128xf32, #tpu.memory_space<vmem>>, vector<1x1x8x128xf32>,
    %c0_78 = arith.constant 0 : index
    %c7 = arith.constant 7 : index
    %c0_79 = arith.constant 0 : index
    %c0_80 = arith.constant 0 : index
    %104 = vector.load %arg4[%c0_78, %c7, %c0_79, %c0_80] : memref<1x8x8x128xf32, #tpu.memory_space<vmem>>, vector<1x1x8x128xf32>
    %105 = vector.shape_cast %104 : vector<1x1x8x128xf32> to vector<8x128xf32>
    %106 = vector.shape_cast %44 : vector<8x128xf32> to vector<1x8x128xf32>
    %cst_81 = arith.constant dense<0x7F800000> : vector<8x128xf32>
    %107 = vector.multi_reduction <minimumf>, %106, %cst_81 [0] : vector<1x8x128xf32> to vector<8x128xf32>
    %108 = arith.minimumf %105, %107 : vector<8x128xf32>
    %c0_82 = arith.constant 0 : index
    %c7_83 = arith.constant 7 : index
    %c0_84 = arith.constant 0 : index
    %c0_85 = arith.constant 0 : index
    %109 = vector.load %arg4[%c0_82, %c7_83, %c0_84, %c0_85] : memref<1x8x8x128xf32, #tpu.memory_space<vmem>>, vector<1x1x8x128xf32>
    %110 = vector.shape_cast %109 : vector<1x1x8x128xf32> to vector<8x128xf32>
    %111 = vector.shape_cast %108 : vector<8x128xf32> to vector<1x1x8x128xf32>
    tpu.vector_store %arg4[%c0_82, %c7_83, %c0_84, %c0_85], %111 {strides = array<i32>} : memref<1x8x8x128xf32, #tpu.memory_space<vmem>>, vector<1x1x8x128xf32>,
    return
  }
  func.func @transform_0(%arg0: i32, %arg1: i32) -> (i32, i32, i32, i32) {
    %c0_i32 = arith.constant 0 : i32
    %c0_i32_0 = arith.constant 0 : i32
    %c0_i32_1 = arith.constant 0 : i32
    return %arg0, %c0_i32, %arg1, %c0_i32_0 : i32, i32, i32, i32
  }
  func.func @transform_1(%arg0: i32, %arg1: i32) -> (i32, i32, i32, i32) {
    %c0_i32 = arith.constant 0 : i32
    %c0_i32_0 = arith.constant 0 : i32
    %c0_i32_1 = arith.constant 0 : i32
    return %arg0, %c0_i32, %arg1, %c0_i32_0 : i32, i32, i32, i32
  }
  func.func @transform_2(%arg0: i32, %arg1: i32) -> (i32, i32, i32, i32) {
    %c0_i32 = arith.constant 0 : i32
    %c0_i32_0 = arith.constant 0 : i32
    %c0_i32_1 = arith.constant 0 : i32
    %c0_i32_2 = arith.constant 0 : i32
    return %arg0, %c0_i32, %c0_i32_0, %c0_i32_1 : i32, i32, i32, i32
  }
}

</mosaic_0001>

<bundles_post_ra>
// kernel: np_branch_loss.1
= control target key start
LH: loop header
LB: loop body
LE: loop exit
PB: predicated region body
PF: predicated region fallthrough
CT: control target
= control target key end

     0   :  { %s548_s9 = smov 0   ;;  %s550_s10 = smov 0   ;;  %s660_s0 = inlined_call_operand.vmem [shape: f32[2,4,8,128], index: 0, kind: input, shape index: {}]   ;;  %s661_s1 = inlined_call_operand.vmem [shape: f32[2,4,8,128], index: 1, kind: input, shape index: {}]   ;;  %s662_s2 = inlined_call_operand.vmem [shape: f32[2,8,8,128], index: 2, kind: output, shape index: {}]  }
   0x1   :  { %s552_s11 = smov 0  }
   0x2 LB: > { %s24_s12 = sadd.s32 1, %s527_s10  ;;  %p431_p0 = scmp.ge.s32.totalorder %s531_s11, 1  ;;  %s531_s11 = sphi %s552_s11, %s12_s11   ;;  %s527_s10 = sphi %s550_s10, %s664_s10   ;;  %s523_s9 = sphi %s548_s9, %s663_s9  }
   0x3   : > { %p26_p1 = scmp.ge.s32.totalorder %s24_s12, 2  ;;  %p144_p2 = scmp.lt.s32.totalorder %s531_s11, 3 }
   0x5   : > { %s666_s12 = smov (%p26_p1, %s24_s12), 0  ;;  %p145_p3 = pnand %p431_p0, %p144_p2 }
   0x6   : > { %p177_p4 = scmp.lt.s32.totalorder (!%p145_p3), %s523_s9, 1 }
   0x7   : > { %148 = sbr.rel (%p145_p3) target bundleno = 55 (0x37), region = 28 }
   0xc   : > { %s668_s9 = smov (!%p177_p4, %s523_s9), 1  ;;  %v206_v0 = vlaneseq }
   0xd   : > { %s461_s13 = sshll.u32 %s668_s9, 5  ;;  %s463_s20 = sshll.u32 %s668_s9, 6 }
   0xe   : > { %s184_s16 = scalar_lea.vmem %s660_s0, %s461_s13  ;;  %s192_s19 = scalar_lea.vmem %s661_s1, %s461_s13  ;;  %v207_v4 = vshrl.u32 %v206_v0, 7  ;;  %v209_v24 = vand.u32 127, %v206_v0 }
   0xf   : > { %v575_v1 = vld [vmem:[%s184_s16] sm:$0xff]  ;;  %v577_v2 = vld [vmem:[%s184_s16 + $0x8] sm:$0xff]  ;;  %v579_v3 = vld [vmem:[%s184_s16 + $0x10] sm:$0xff]  ;;  %s625_s23 = scalar_lea.vmem %s662_s2, %s463_s20 }
  0x10   : > { %v581_v5 = vld [vmem:[%s184_s16 + $0x18] sm:$0xff]  ;;  %v202_v6 = vld [vmem:[%s192_s19] sm:$0xff]  ;;  %v583_v7 = vld [vmem:[%s192_s19 + $0x8] sm:$0xff]  ;;  %v216_v8 = vmax.f32 %v575_v1, %v577_v2  ;;  %v252_v9 = vmul.f32 0.5, %v575_v1  ;;  %v253_v10 = vmul.f32 0.5, %v577_v2  ;;  %v254_v11 = vmul.f32 0.5, %v579_v3 }
  0x11   : > { %v590_v12 = vld [vmem:[%s192_s19 + $0x10] sm:$0xff]  ;;  %v592_v13 = vld [vmem:[%s192_s19 + $0x18] sm:$0xff]  ;;  %v217_v14 = vmax.f32 %v579_v3, %v581_v5  ;;  %v240_v15 = vadd.f32 %v583_v7, %v202_v6  ;;  %v243_v16 = vmul.f32 %v202_v6, %v575_v1  ;;  %v244_v17 = vmul.f32 %v583_v7, %v577_v2 }
  0x12   : > { %v245_v18 = vmul.f32 %v590_v12, %v579_v3  ;;  %v246_v19 = vmul.f32 %v592_v13, %v581_v5  ;;  %v255_v20 = vmul.f32 0.5, %v581_v5  ;;  %491 = vtanh.f32 %v252_v9 }
  0x13   : > { %v605_v21 = vmax.f32 %v216_v8, %v217_v14  ;;  %v241_v22 = vadd.f32 %v240_v15, %v590_v12  ;;  %v247_v23 = vadd.f32 %v244_v17, %v243_v16  ;;  %493 = vtanh.f32 %v253_v10 }
  0x14   : > { %495 = vtanh.f32 %v254_v11  ;;  %v213_v25 = vmul.u32 128, %v207_v4  ;;  %v278_v26 = vadd.f32 %v577_v2, %v575_v1  ;;  %v219_v51 = vmin.f32 %v575_v1, %v577_v2 }
  0x15   : > { %v222_v27 = vsub.f32 %v575_v1, %v605_v21  ;;  %v223_v28 = vsub.f32 %v577_v2, %v605_v21  ;;  %v224_v29 = vsub.f32 %v579_v3, %v605_v21  ;;  %v225_v30 = vsub.f32 %v581_v5, %v605_v21 }
  0x16   : > { %v620_v31 = vadd.f32 %v241_v22, %v592_v13  ;;  %v248_v32 = vadd.f32 %v247_v23, %v245_v18  ;;  %497 = vtanh.f32 %v255_v20  ;;  %v214_v33 = vadd.s32 %v213_v25, %v209_v24 }
  0x17   : > { %v226_v34 = vmul.f32 1.442695, %v222_v27  ;;  %v228_v35 = vmul.f32 1.442695, %v223_v28  ;;  %v230_v36 = vmul.f32 1.442695, %v224_v29  ;;  %v279_v37 = vadd.f32 %v278_v26, %v579_v3 }
  0x18   : > { %v492_v38 = vpop.eup %491  ;;  %v232_v39 = vmul.f32 1.442695, %v225_v30  ;;  %v249_v40 = vadd.f32 %v248_v32, %v246_v19  ;;  %vm215_vm0 = vcmp.lt.s32.totalorder %v214_v33, 256  ;;  %450 = vst [vmem:[%s625_s23 + $0x18] sm:$0xff] %v620_v31  ;;  %v220_v52 = vmin.f32 %v579_v3, %v581_v5 }
  0x19   : > { %v494_v41 = vpop.eup %493  ;;  %499 = vpow2.f32 %v226_v34  ;;  %v260_v42 = vmul.f32 0.5, %v492_v38  ;;  %v280_v43 = vadd.f32 %v279_v37, %v581_v5  ;;  %v282_v44 = vsel %vm215_vm0, %v605_v21, -inf }
  0x1a   : > { %v496_v45 = vpop.eup %495  ;;  %501 = vpow2.f32 %v228_v35  ;;  %v261_v46 = vmul.f32 0.5, %v494_v41  ;;  %452 = vst [vmem:[%s625_s23 + $0x20] sm:$0xff] %v249_v40  ;;  %v221_v58 = vmin.f32 %v219_v51, %v220_v52 }
  0x1b   : > { %503 = vpow2.f32 %v230_v36  ;;  %v262_v47 = vmul.f32 0.5, %v496_v45  ;;  %v264_v48 = vadd.f32 0.5, %v260_v42  ;;  %454 = vst [vmem:[%s625_s23 + $0x28] sm:$0xff] %v280_v43 }
  0x1c   : > { %v498_v49 = vpop.eup %497  ;;  %505 = vpow2.f32 %v232_v39  ;;  %v265_v50 = vadd.f32 0.5, %v261_v46  ;;  %456 = vst [vmem:[%s625_s23 + $0x30] sm:$0xff] %v282_v44  ;;  %v283_v1 = vsel %vm215_vm0, %v221_v58, inf }
  0x1d   : > { %v263_v53 = vmul.f32 0.5, %v498_v49  ;;  %v266_v54 = vadd.f32 0.5, %v262_v47  ;;  %v268_v55 = vmul.f32 %v264_v48, %v202_v6  ;;  %458 = vst [vmem:[%s625_s23 + $0x38] sm:$0xff] %v283_v1 }
  0x1e   : > { %v269_v56 = vmul.f32 %v265_v50, %v583_v7  ;;  %v275_v57 = vadd.f32 %v265_v50, %v264_v48 }
  0x1f   : > { %v500_v59 = vpop.eup %499  ;;  %v267_v60 = vadd.f32 0.5, %v263_v53  ;;  %v270_v61 = vmul.f32 %v266_v54, %v590_v12 }
  0x20   : > { %v502_v62 = vpop.eup %501  ;;  %v272_v63 = vadd.f32 %v269_v56, %v268_v55  ;;  %v276_v0 = vadd.f32 %v275_v57, %v266_v54 }
  0x21   : > { %v504_v2 = vpop.eup %503  ;;  %v234_v3 = vadd.f32 %v502_v62, %v500_v59  ;;  %v271_v4 = vmul.f32 %v267_v60, %v592_v13 }
  0x22   : > { %v506_v5 = vpop.eup %505  ;;  %v273_v6 = vadd.f32 %v272_v63, %v270_v61  ;;  %v277_v7 = vadd.f32 %v276_v0, %v267_v60 }
  0x23   : > { %v235_v8 = vadd.f32 %v504_v2, %v234_v3 }
  0x24   : > { %v274_v9 = vadd.f32 %v273_v6, %v271_v4  ;;  %v281_v10 = vsel %vm215_vm0, %v277_v7, 0.0 }
  0x25   : > { %v236_v11 = vadd.f32 %v506_v5, %v235_v8  ;;  %448 = vst [vmem:[%s625_s23 + $0x10] sm:$0xff] %v281_v10 }
  0x26   : > { %446 = vst [vmem:[%s625_s23 + $0x8] sm:$0xff] %v274_v9 }
  0x27   : > { %507 = vlog2.f32 %v236_v11 }
  0x2d   : > { %v508_v12 = vpop.eup %507 }
  0x2e   : > { %v238_v14 = vmul.f32 0.6931472, %v508_v12 }
  0x30   : > { %v239_v15 = vadd.f32 %v238_v14, %v605_v21 }
  0x32   : > { %v250_v16 = vmul.f32 %v620_v31, %v239_v15 }
  0x34   : > { %v251_v13 = vsub.f32 %v250_v16, %v249_v40 }
  0x36   : > { %306 = vst [vmem:[%s625_s23] sm:$0xff] %v251_v13 }
  0x37 PF: > { %s12_s11 = sadd.s32 1, %s531_s11   ;;  %s663_s9 = smov %s527_s10 }
  0x38   : > { %p9_p5 = scmp.ge.s32.totalorder %s12_s11, 4   ;;  %s664_s10 = smov %s666_s12 }
  0x3a   :  { %11 = sbr.rel (!%p9_p5) target bundleno = 2 (0x2), region = 79 }

</bundles_post_ra>
